<compile_context>
chip_gen: v5e
topology: v5e:2x2
jax: 0.10.0
libtpu: 0.0.40
codegen_flags: <defaults>
</compile_context>

<pallas_src>
import jax
import jax.numpy as jnp
from jax import lax
from jax.experimental import pallas as pl
from jax.experimental.pallas import tpu as pltpu


def _round_up(n, m):
    return ((n + m - 1) // m) * m


def _critic_kernel(x_ref, u_ref, w1x_ref, w1u_ref, w2_ref, pb_ref, o_ref):
    """One batch tile of the critic MLP.

    pb packs: row 0 = b1, row 1 = b2, row 2 = w3 (as a row), row 3 = b3
    (replicated).  Output block is (1, 1, tb): batch on the LANE axis.
    """
    pb = pb_ref[...]                      # (4, H)
    b1 = pb[0:1, :]                       # (1, H)
    b2 = pb[1:2, :]                       # (1, H)
    w3 = pb[2:3, :]                       # (1, H)
    b3 = pb[3:4, 0:1]                     # (1, 1)

    # layer 1: relu( [x, u] @ W1 + b1 ) as two accumulating MXU dots
    # (the concat is fused into the kernel; no wrapper HBM round trip).
    h1 = jnp.dot(x_ref[...], w1x_ref[...], preferred_element_type=jnp.float32)
    h1 = h1 + jnp.dot(u_ref[...], w1u_ref[...], preferred_element_type=jnp.float32)
    h1 = jnp.maximum(h1 + b1, 0.0)

    # layer 2: relu( h1 @ W2 + b2 )
    h2 = jnp.dot(h1, w2_ref[...], preferred_element_type=jnp.float32) + b2
    h2 = jnp.maximum(h2, 0.0)

    # layer 3 (out dim == 1): contract the feature axis of h2 against w3 on
    # the MXU so the result is a lane-dense (1, tb) row instead of a (tb, 1)
    # column of masked single-lane stores.  w3 is replicated to 8 sublanes;
    # all result rows are identical, keep row 0.
    hidden = w3.shape[1]
    w3_rep = jnp.broadcast_to(w3, (8, hidden))                     # (8, H)
    q = lax.dot_general(w3_rep, h2,
                        dimension_numbers=(((1,), (1,)), ((), ())),
                        preferred_element_type=jnp.float32)        # (8, tb)
    o_ref[0] = q[0:1, :] + b3                                      # (1, tb)


def critic_forward(x, u, params, *, num_tiles=1):
    """x: (B, state_dim) f32, u: (B, action_dim) f32 -> (B, 1) f32.

    num_tiles=1 (default, best on v5e/v6e): one grid step, no padding, no
    extra wrapper ops.  num_tiles=2: shards a large training batch across the
    two TensorCores of a v7x chip while keeping step overhead minimal.
    """
    w1x, w1u, w2, pb = params
    state_dim, hidden = w1x.shape
    action_dim = w1u.shape[0]
    B = x.shape[0]

    if num_tiles <= 1 or B <= 8 * num_tiles:
        nt, tb, bp = 1, B, B
    else:
        nt = num_tiles
        tb = _round_up(pl.cdiv(B, nt), 8)
        bp = tb * nt
        if bp != B:
            x = jnp.pad(x, ((0, bp - B), (0, 0)))
            u = jnp.pad(u, ((0, bp - B), (0, 0)))

    flops = 2 * bp * hidden * (state_dim + action_dim + hidden + 1)
    bytes_accessed = 4 * (x.size + u.size + w1x.size + w1u.size + w2.size
                          + pb.size + bp)

    out = pl.pallas_call(
        _critic_kernel,
        out_shape=jax.ShapeDtypeStruct((nt, 1, tb), jnp.float32),
        grid_spec=pltpu.PrefetchScalarGridSpec(
            num_scalar_prefetch=0,
            grid=(nt,),
            in_specs=[
                # activations: tiled over the batch axis
                pl.BlockSpec((tb, state_dim), lambda i: (i, 0)),
                pl.BlockSpec((tb, action_dim), lambda i: (i, 0)),
                # weights / packed biases: constant index_map -> VMEM-resident
                pl.BlockSpec((state_dim, hidden), lambda i: (0, 0)),
                pl.BlockSpec((action_dim, hidden), lambda i: (0, 0)),
                pl.BlockSpec((hidden, hidden), lambda i: (0, 0)),
                pl.BlockSpec((4, hidden), lambda i: (0, 0)),
            ],
            out_specs=pl.BlockSpec((1, 1, tb), lambda i: (i, 0, 0)),
        ),
        compiler_params=pltpu.CompilerParams(
            dimension_semantics=("parallel",)),
        cost_estimate=pl.CostEstimate(
            flops=flops, transcendentals=0, bytes_accessed=bytes_accessed),
    )(x, u, w1x, w1u, w2, pb)

    # (nt, 1, tb) lane-major rows -> (B, 1) column, dropping padded rows.
    return out.reshape(-1, 1)[:B]


def init_critic_params(key, state_dim, action_dim, hidden_dim):
    """Deterministic synthetic parameters (PyTorch nn.Linear-like uniform init)."""
    critic_dim = state_dim + action_dim
    ks = jax.random.split(key, 6)

    def lin(kw, kb, fan_in, fan_out):
        bound = 1.0 / (float(fan_in) ** 0.5)
        w = jax.random.uniform(kw, (fan_in, fan_out), jnp.float32, -bound, bound)
        b = jax.random.uniform(kb, (fan_out,), jnp.float32, -bound, bound)
        return w, b

    w1, b1 = lin(ks[0], ks[1], critic_dim, hidden_dim)   # (critic_dim, H), (H,)
    w2, b2 = lin(ks[2], ks[3], hidden_dim, hidden_dim)   # (H, H), (H,)
    w3, b3 = lin(ks[4], ks[5], hidden_dim, 1)            # (H, 1), (1,)

    # Pack b1 / b2 / w3-row / b3 into one (4, H) buffer -> single small DMA.
    pb = jnp.stack([b1, b2, w3[:, 0],
                    jnp.full((hidden_dim,), b3[0], jnp.float32)], axis=0)
    # W1 split into its x-rows and u-rows so the concat fuses into the kernel.
    return (w1[:state_dim], w1[state_dim:], w2, pb)


def critic_reference(x, u, params):
    """Plain-JAX reference matching the PyTorch forward exactly."""
    w1x, w1u, w2, pb = params
    b1, b2 = pb[0], pb[1]
    w3 = pb[2][:, None]
    b3 = pb[3, 0]
    h1 = jax.nn.relu(x @ w1x + u @ w1u + b1)   # == relu(cat([x,u],1) @ W1 + b1)
    h2 = jax.nn.relu(h1 @ w2 + b2)
    return h2 @ w3 + b3


if __name__ == "__main__":
    key = jax.random.PRNGKey(0)
    k_x, k_u, k_p = jax.random.split(key, 3)

    state_dim, action_dim, hidden_dim = 12, 4, 32
    params = init_critic_params(k_p, state_dim, action_dim, hidden_dim)

    # Small inference-style batch: single grid step, no padding, no wrapper ops.
    batch = 8
    x = jax.random.normal(k_x, (batch, state_dim), jnp.float32)
    u = jax.random.normal(k_u, (batch, action_dim), jnp.float32)
    out = jax.block_until_ready(critic_forward(x, u, params))
    ref = critic_reference(x, u, params)
    assert out.shape == (batch, 1), out.shape
    assert jnp.allclose(out, ref, atol=2e-5, rtol=1e-5), (out, ref)

    # Ragged batch through the 2-tile (v7x megacore-friendly) path.
    batch2 = 40
    x2 = jax.random.normal(jax.random.PRNGKey(1), (batch2, state_dim), jnp.float32)
    u2 = jax.random.normal(jax.random.PRNGKey(2), (batch2, action_dim), jnp.float32)
    out2 = jax.block_until_ready(critic_forward(x2, u2, params, num_tiles=2))
    ref2 = critic_reference(x2, u2, params)
    assert out2.shape == (batch2, 1), out2.shape
    assert jnp.allclose(out2, ref2, atol=2e-5, rtol=1e-5), (out2, ref2)

    print("KERNEL_OK")
</pallas_src>

<mosaic_0001>
module attributes {stable_mosaic.version = 11 : i64} {
  func.func @_critic_kernel(%arg0: i32, %arg1: memref<8x12xf32, #tpu.memory_space<vmem>>, %arg2: memref<8x4xf32, #tpu.memory_space<vmem>>, %arg3: memref<12x32xf32, #tpu.memory_space<vmem>>, %arg4: memref<4x32xf32, #tpu.memory_space<vmem>>, %arg5: memref<32x32xf32, #tpu.memory_space<vmem>>, %arg6: memref<4x32xf32, #tpu.memory_space<vmem>>, %arg7: memref<1x1x8xf32, #tpu.memory_space<vmem>>) attributes {dimension_semantics = [#tpu.dimension_semantics<parallel>], iteration_bounds = array<i64: 1>, scalar_prefetch = 0 : i64, scratch_operands = 0 : i64, tpu.core_type = #tpu.core_type<tc>, window_params = [{transform_indices = @transform_0, window_bounds = array<i64: 8, 12>}, {transform_indices = @transform_1, window_bounds = array<i64: 8, 4>}, {pipeline_mode = #tpu.pipeline_mode<synchronous>, transform_indices = @transform_2, window_bounds = array<i64: 12, 32>}, {pipeline_mode = #tpu.pipeline_mode<synchronous>, transform_indices = @transform_3, window_bounds = array<i64: 4, 32>}, {pipeline_mode = #tpu.pipeline_mode<synchronous>, transform_indices = @transform_4, window_bounds = array<i64: 32, 32>}, {pipeline_mode = #tpu.pipeline_mode<synchronous>, transform_indices = @transform_5, window_bounds = array<i64: 4, 32>}, {transform_indices = @transform_6, window_bounds = array<i64: 1, 1, 8>}]} {
    %c0 = arith.constant 0 : index
    %c0_0 = arith.constant 0 : index
    %0 = vector.load %arg6[%c0, %c0_0] : memref<4x32xf32, #tpu.memory_space<vmem>>, vector<4x32xf32>
    %1 = vector.extract_strided_slice %0 {offsets = [0, 0], sizes = [1, 32], strides = [1, 1]} : vector<4x32xf32> to vector<1x32xf32>
    %2 = vector.extract_strided_slice %0 {offsets = [1, 0], sizes = [1, 32], strides = [1, 1]} : vector<4x32xf32> to vector<1x32xf32>
    %3 = vector.extract_strided_slice %0 {offsets = [2, 0], sizes = [1, 32], strides = [1, 1]} : vector<4x32xf32> to vector<1x32xf32>
    %4 = vector.extract_strided_slice %0 {offsets = [3, 0], sizes = [1, 1], strides = [1, 1]} : vector<4x32xf32> to vector<1x1xf32>
    %c0_1 = arith.constant 0 : index
    %c0_2 = arith.constant 0 : index
    %5 = vector.load %arg1[%c0_1, %c0_2] : memref<8x12xf32, #tpu.memory_space<vmem>>, vector<8x12xf32>
    %c0_3 = arith.constant 0 : index
    %c0_4 = arith.constant 0 : index
    %6 = vector.load %arg3[%c0_3, %c0_4] : memref<12x32xf32, #tpu.memory_space<vmem>>, vector<12x32xf32>
    %cst = arith.constant dense<0.000000e+00> : vector<8x32xf32>
    %7 = tpu.matmul %5, %6, %cst {dimension_numbers = #tpu.dot_dimension_numbers<[1], [0], [0], [1], [0, 0, 1, 1], [], []>} : vector<8x12xf32>, vector<12x32xf32>, vector<8x32xf32> -> vector<8x32xf32>
    %c0_5 = arith.constant 0 : index
    %c0_6 = arith.constant 0 : index
    %8 = vector.load %arg2[%c0_5, %c0_6] : memref<8x4xf32, #tpu.memory_space<vmem>>, vector<8x4xf32>
    %c0_7 = arith.constant 0 : index
    %c0_8 = arith.constant 0 : index
    %9 = vector.load %arg4[%c0_7, %c0_8] : memref<4x32xf32, #tpu.memory_space<vmem>>, vector<4x32xf32>
    %cst_9 = arith.constant dense<0.000000e+00> : vector<8x32xf32>
    %10 = tpu.matmul %8, %9, %cst_9 {dimension_numbers = #tpu.dot_dimension_numbers<[1], [0], [0], [1], [0, 0, 1, 1], [], []>} : vector<8x4xf32>, vector<4x32xf32>, vector<8x32xf32> -> vector<8x32xf32>
    %11 = arith.addf %7, %10 : vector<8x32xf32>
    %12 = vector.broadcast %1 : vector<1x32xf32> to vector<8x32xf32>
    %13 = arith.addf %11, %12 : vector<8x32xf32>
    %cst_10 = arith.constant 0.000000e+00 : f32
    %14 = vector.broadcast %cst_10 : f32 to vector<8x32xf32>
    %15 = arith.maximumf %13, %14 : vector<8x32xf32>
    %c0_11 = arith.constant 0 : index
    %c0_12 = arith.constant 0 : index
    %16 = vector.load %arg5[%c0_11, %c0_12] : memref<32x32xf32, #tpu.memory_space<vmem>>, vector<32x32xf32>
    %cst_13 = arith.constant dense<0.000000e+00> : vector<8x32xf32>
    %17 = tpu.matmul %15, %16, %cst_13 {dimension_numbers = #tpu.dot_dimension_numbers<[1], [0], [0], [1], [0, 0, 1, 1], [], []>} : vector<8x32xf32>, vector<32x32xf32>, vector<8x32xf32> -> vector<8x32xf32>
    %18 = vector.broadcast %2 : vector<1x32xf32> to vector<8x32xf32>
    %19 = arith.addf %17, %18 : vector<8x32xf32>
    %cst_14 = arith.constant 0.000000e+00 : f32
    %20 = vector.broadcast %cst_14 : f32 to vector<8x32xf32>
    %21 = arith.maximumf %19, %20 : vector<8x32xf32>
    %22 = vector.shape_cast %3 : vector<1x32xf32> to vector<1x32xf32>
    %23 = vector.broadcast %22 : vector<1x32xf32> to vector<8x32xf32>
    %cst_15 = arith.constant dense<0.000000e+00> : vector<8x8xf32>
    %24 = tpu.matmul %23, %21, %cst_15 {dimension_numbers = #tpu.dot_dimension_numbers<[1], [1], [0], [0], [0, 0, 1, 0], [], []>} : vector<8x32xf32>, vector<8x32xf32>, vector<8x8xf32> -> vector<8x8xf32>
    %25 = vector.extract_strided_slice %24 {offsets = [0, 0], sizes = [1, 8], strides = [1, 1]} : vector<8x8xf32> to vector<1x8xf32>
    %26 = vector.broadcast %4 : vector<1x1xf32> to vector<1x8xf32>
    %27 = arith.addf %25, %26 : vector<1x8xf32>
    %c0_16 = arith.constant 0 : index
    %c0_17 = arith.constant 0 : index
    %c0_18 = arith.constant 0 : index
    %28 = vector.load %arg7[%c0_16, %c0_17, %c0_18] : memref<1x1x8xf32, #tpu.memory_space<vmem>>, vector<1x1x8xf32>
    %29 = vector.shape_cast %28 : vector<1x1x8xf32> to vector<1x8xf32>
    %30 = vector.shape_cast %27 : vector<1x8xf32> to vector<1x1x8xf32>
    tpu.vector_store %arg7[%c0_16, %c0_17, %c0_18], %30 {strides = array<i32>} : memref<1x1x8xf32, #tpu.memory_space<vmem>>, vector<1x1x8xf32>,
    return
  }
  func.func @transform_0(%arg0: i32) -> (i32, i32) {
    %c0_i32 = arith.constant 0 : i32
    %c0_i32_0 = arith.constant 0 : i32
    return %arg0, %c0_i32 : i32, i32
  }
  func.func @transform_1(%arg0: i32) -> (i32, i32) {
    %c0_i32 = arith.constant 0 : i32
    %c0_i32_0 = arith.constant 0 : i32
    return %arg0, %c0_i32 : i32, i32
  }
  func.func @transform_2(%arg0: i32) -> (i32, i32) {
    %c0_i32 = arith.constant 0 : i32
    %c0_i32_0 = arith.constant 0 : i32
    %c0_i32_1 = arith.constant 0 : i32
    return %c0_i32, %c0_i32_0 : i32, i32
  }
  func.func @transform_3(%arg0: i32) -> (i32, i32) {
    %c0_i32 = arith.constant 0 : i32
    %c0_i32_0 = arith.constant 0 : i32
    %c0_i32_1 = arith.constant 0 : i32
    return %c0_i32, %c0_i32_0 : i32, i32
  }
  func.func @transform_4(%arg0: i32) -> (i32, i32) {
    %c0_i32 = arith.constant 0 : i32
    %c0_i32_0 = arith.constant 0 : i32
    %c0_i32_1 = arith.constant 0 : i32
    return %c0_i32, %c0_i32_0 : i32, i32
  }
  func.func @transform_5(%arg0: i32) -> (i32, i32) {
    %c0_i32 = arith.constant 0 : i32
    %c0_i32_0 = arith.constant 0 : i32
    %c0_i32_1 = arith.constant 0 : i32
    return %c0_i32, %c0_i32_0 : i32, i32
  }
  func.func @transform_6(%arg0: i32) -> (i32, i32, i32) {
    %c0_i32 = arith.constant 0 : i32
    %c0_i32_0 = arith.constant 0 : i32
    %c0_i32_1 = arith.constant 0 : i32
    return %arg0, %c0_i32, %c0_i32_0 : i32, i32, i32
  }
}

</mosaic_0001>

<bundles_post_ra>
// kernel: tpu_custom_call.1
= control target key start
LH: loop header
LB: loop body
LE: loop exit
PB: predicated region body
PF: predicated region fallthrough
CT: control target
= control target key end

     0   :  { %11 = vsyncpa [#allocation3], 0  ;;  %s358_s0 = inlined_call_operand.vmem [shape: f32[8,12], index: 0, kind: input, shape index: {}]   ;;  %s359_s1 = inlined_call_operand.vmem [shape: f32[8,4], index: 1, kind: input, shape index: {}]   ;;  %s360_s2 = inlined_call_operand.hbm [shape: f32[12,32], index: 2, kind: input, shape index: {}]   ;;  %s361_s3 = inlined_call_operand.vmem [shape: f32[4,32], index: 3, kind: input, shape index: {}]   ;;  %s362_s4 = inlined_call_operand.hbm [shape: f32[32,32], index: 4, kind: input, shape index: {}]   ;;  %s363_s5 = inlined_call_operand.vmem [shape: f32[4,32], index: 5, kind: input, shape index: {}]   ;;  %s364_s6 = inlined_call_operand.hbm [shape: f32[1,1,8], index: 6, kind: output, shape index: {}]  }
   0x1   :  { %12 = vsyncpa [#allocation6], 0 }
   0x2   :  { %13 = vsyncpa [#allocation4], 0  ;;  %s22_s23 = sshll.u32 %s360_s2, 4  ;;  %s296_s24 = smov [#allocation2]   ;;  %s23_s23 = int_to_ptr.hbm [resolvable:$true] %s22_s23 }
   0x3   :  { %s24_s25 = sshll.u32 %s296_s24, 4  ;;  %s37_s28 = sshll.u32 %s362_s4, 4  ;;  %s25_s25 = int_to_ptr.vmem [resolvable:$true] %s24_s25  ;;  %s38_s28 = int_to_ptr.hbm [resolvable:$true] %s37_s28 }
   0x4   :  { %s297_s29 = smov 128   ;;  %s298_s30 = smov 8  }
   0x5   :  { %30 = dma.hbm_to_vmem [thread:$0]  %s23_s23, 256, %s25_s25, [#allocation3], %s297_s29, %s297_s29, %s298_s30  }
   0x6   :  { %s299_s7 = smov [#allocation5]  }
   0x7   :  { %s39_s8 = sshll.u32 %s299_s7, 4  ;;  %s40_s8 = int_to_ptr.vmem [resolvable:$true] %s39_s8 }
   0x8   :  { %45 = dma.hbm_to_vmem [thread:$0]  %s38_s28, 512, %s40_s8, [#allocation6], %s297_s29, %s297_s29, %s298_s30  }
   0x9   :  { %290 = dma.done.wait [#allocation3], 256  }
   0xa   :  { %291 = vsyncadd [#allocation3], 4294967040 }
   0xb   :  { %292 = dma.done.wait [#allocation6], 512  }
   0xc   :  { %293 = vsyncadd [#allocation6], 4294966784  ;;  %vm66_vm0 = vcmask 1043456   ;;  %vm62_vm1 = vcmask 31744   ;;  %v59_v0 = vld [vmem:[#allocation2 + $0x8] sm:$0xf] }
   0xd   :  { %v61_v1 = vld [vmem:[%s361_s3] sm:$0xf]  ;;  %206 = vmatpush.msk.msra.mxu1 %vm66_vm0, %v59_v0  ;;  %vm90_vm2 = vcmask 97280   ;;  %v123_v5 = vld [vmem:[#allocation5 + $0x18] sm:$0xff]  ;;  %v121_v7 = vld [vmem:[#allocation5 + $0x8] sm:$0xff]  ;;  %vm125_vm3 = vcmask 261120  }
   0xe   :  { %v58_v2 = vld [vmem:[#allocation2] sm:$0xff]  ;;  %204 = vmatpush.msk.msra.mxu0 %vm66_vm0, %v61_v1  ;;  %141 = vmatpush.msra.mxu2 %v123_v5  ;;  %v120_v8 = vld [vmem:[#allocation5] sm:$0xff]  ;;  %v300_v16 = vmov 0   ;;  %s193_s15 = sshll.u32 %s364_s6, 4  ;;  %vm184_vm4 = vcmask 57344   ;;  %s194_s15 = int_to_ptr.hbm [resolvable:$true] %s193_s15 }
   0xf   :  { %v60_v3 = vld [vmem:[%s359_s1] sm:$0xff]  ;;  %112 = vmatpush.msra.mxu1 %v58_v2  ;;  %217 = vset.pattern.permute.xlu0 %v300_v16 }
  0x10   :  { %v57_v4 = vld [vmem:[%s358_s0] sm:$0xff]  ;;  %205 = vmatmul.msk.f32.vlgmr.msra.gmra.mxu0 %vm62_vm1, %v60_v3  ;;  %s301_s0 = smov [#allocation7]  }
  0x11   :  { %207 = vmatmul.msk.f32.vlgmr.msra.gmra.mxu1 %vm90_vm2, %v57_v4  ;;  %v122_v6 = vld [vmem:[#allocation5 + $0x10] sm:$0xff]  ;;  %s191_s1 = sshll.u32 %s301_s0, 4  ;;  %s192_s1 = int_to_ptr.vmem [resolvable:$true] %s191_s1 }
  0x12   :  { %142 = vmatpush.msra.mxu2 %v122_v6  ;;  %v56_v9 = vld [vmem:[%s363_s5] sm:$0xf] }
  0x13   :  { %v117_v11 = vperm.slane %v56_v9, 0  ;;  %179 = vperm.xlu0 %217, %v56_v9   ;;  %v124_v17 = vperm.slane %v56_v9, 1  ;;  %v150_v21 = vperm.slane %v56_v9, 2 }
  0x14   :  { %143 = vmatpush.msra.mxu2 %v121_v7 }
  0x16   :  { %144 = vmatpush.msra.mxu2 %v120_v8 }
  0x85   :  { %v180_v22 = vpop.permute.xlu0 %179 }
  0x86   :  { %v181_v23 = vrot.slane %v180_v22, 3 }
  0x8d   :  { %v87_v10 = vpop.f32.mrf.mxu0 }
  0x8e   :  { %v114_v12 = vpop.f32.mrf.mxu1 }
  0x8f   :  { %v115_v13 = vadd.f32 %v114_v12, %v87_v10 }
  0x91   :  { %v118_v14 = vadd.f32 %v117_v11, %v115_v13 }
  0x93   :  { %v119_v15 = vmax.f32 %v118_v14, 0.0 }
  0x95   :  { %208 = vmatmul.msk.f32.vlgmr.msra.gmra.mxu2 %vm125_vm3, %v119_v15 }
 0x118   :  { %v146_v18 = vpop.f32.mrf.mxu2 }
 0x119   :  { %v147_v19 = vadd.f32 %v146_v18, %v124_v17 }
 0x11b   :  { %v149_v20 = vmax.f32 %v147_v19, 0.0 }
 0x11d   :  { %209 = vmatpush.xpose.msk.msra.mxu3 %vm125_vm3, %v149_v20 }
 0x120   :  { %210 = vmatmul.msk.f32.vlgmr.msra.gmra.mxu3 %vm125_vm3, %v150_v21 }
 0x1a3   :  { %v174_v24 = vpop.f32.mrf.mxu3 }
 0x1a4   :  { %v183_v25 = vadd.f32 %v181_v23, %v174_v24 }
 0x1a6   :  { %185 = vst.msk [vmem:[#allocation7] sm:$0x1] %vm184_vm4, %v183_v25 }
 0x1a7   :  { %196 = dma.vmem_to_hbm [thread:$0]  %s192_s1, 16, %s194_s15, [#allocation4]  }
 0x1a8   :  { %294 = dma.done.wait [#allocation4], 16  }
 0x1a9   :  { %295 = vsyncadd [#allocation4], 4294967280 }
 0x1aa   :  { %201 = vsyncpa [#allocation3], 1 }
 0x1ab   :  { %202 = vsyncpa [#allocation6], 1 }
 0x1ac   :  { %203 = vsyncpa [#allocation4], 1 }

</bundles_post_ra>
